<compile_context>
chip_gen: v5e
topology: v5e:2x2
jax: 0.10.0
libtpu: 0.0.40
codegen_flags: <defaults>
</compile_context>

<pallas_src>
import jax
import jax.numpy as jnp
from jax import lax
from jax.experimental import pallas as pl
from jax.experimental.pallas import tpu as pltpu


def _round_up(n, m):
    return ((n + m - 1) // m) * m


def _is_v5e():
    """Static device-kind check: split the K=2D matmul only on v5e (128-deep MXU)."""
    try:
        kind = jax.devices()[0].device_kind.lower()
        return ("v5 lite" in kind) or ("v5e" in kind) or ("v5litepod" in kind)
    except Exception:
        return False


def _make_ufd_kernel(D, c_pad, split_wf):
    """Build the fused kernel body. `split_wf` selects the v5e feature-mapper path."""

    def ufd_kernel(
        x_ref,                               # (TILE_B, D) f32
        w1g_ref, w2g_ref,                    # adaptor_global weights (D, D) bf16
        w1d_ref, w2d_ref,                    # adaptor_domain weights (D, D) bf16
        wf_ref,                              # feature mapper (2D, D) bf16
        wc_ref,                              # classifier (D, c_pad) bf16 (zero-padded cols)
        bias_ref,                            # (8, D_pack) f32 packed bias rows
        logits_ref,                          # (TILE_B, c_pad) bf16
    ):
        x_f32 = x_ref[...]                   # exact f32 input (residual adds)
        x_bf = x_f32.astype(jnp.bfloat16)    # MXU operand

        biases = bias_ref[...]               # (8, D_pack) f32
        b1g = biases[0:1, :D]
        b2g = biases[1:2, :D]
        b1d = biases[2:3, :D]
        b2d = biases[3:4, :D]
        bfm = biases[4:5, :D]
        bc = biases[5:6, :c_pad]

        # ---- adaptor_global ----
        h = jnp.dot(x_bf, w1g_ref[...], preferred_element_type=jnp.float32) + b1g
        h = jnp.maximum(h, 0.0)
        local_g = h + x_f32
        g2 = (
            jnp.dot(local_g.astype(jnp.bfloat16), w2g_ref[...],
                    preferred_element_type=jnp.float32)
            + b2g
        )
        global_feat = jnp.maximum(g2, 0.0) + local_g

        # ---- adaptor_domain ----
        xr = jnp.maximum(x_bf, 0)            # relu(x), stays bf16
        ld = jnp.dot(xr, w1d_ref[...], preferred_element_type=jnp.float32) + b1d
        d2 = (
            jnp.dot(ld.astype(jnp.bfloat16), w2d_ref[...],
                    preferred_element_type=jnp.float32)
            + b2d
        )
        d2 = jnp.maximum(d2, 0.0)
        # F.normalize(p=2, dim=1): d / max(||d||, 1e-12) == d * rsqrt(max(sumsq, 1e-24))
        sumsq = jnp.sum(d2 * d2, axis=1, keepdims=True)
        inv_norm = lax.rsqrt(jnp.maximum(sumsq, 1e-24))
        domain_feat = d2 * inv_norm          # >= 0 already, relu dropped

        # ---- feature mapper: fc(relu(concat(global, domain))) ----
        gr_bf = jnp.maximum(global_feat, 0.0).astype(jnp.bfloat16)
        d_bf = domain_feat.astype(jnp.bfloat16)
        if split_wf:
            # v5e: two accumulating K=D dots, no (TILE_B, 2D) concat copy.
            mapped = (
                jnp.dot(gr_bf, wf_ref[:D, :], preferred_element_type=jnp.float32)
                + jnp.dot(d_bf, wf_ref[D:, :], preferred_element_type=jnp.float32)
                + bfm
            )
        else:
            # v6e/v7x: single K=2D pass fills the 256-deep MXU.
            feats = jnp.concatenate([gr_bf, d_bf], axis=-1)   # bf16 concat (half bytes)
            mapped = (
                jnp.dot(feats, wf_ref[...], preferred_element_type=jnp.float32) + bfm
            )

        # ---- classifier: fc(relu(mapped)) -> lane-dense padded bf16 logits ----
        mr = jnp.maximum(mapped, 0.0).astype(jnp.bfloat16)
        logits = jnp.dot(mr, wc_ref[...], preferred_element_type=jnp.float32) + bc
        logits_ref[...] = logits.astype(logits_ref.dtype)

    return ufd_kernel


def ufd_model_forward(x, params, *, tile_cap=512):
    """Fused UFD forward on TPU. Returns (B, num_class) f32 logits."""
    B, D = x.shape
    c_pad = params["wc"].shape[1]
    num_class = params["num_class"]

    # ---- adaptive batch tile (bf16 output => sublane multiple of 16) ----
    SUB = 16
    Bp0 = _round_up(B, SUB)
    tile_b = min(tile_cap, Bp0)
    # Ensure >= 2 grid steps when there is enough batch to split, so v7x's
    # second TensorCore gets work via dimension_semantics=("parallel",).
    if B > 2 * SUB and Bp0 // tile_b < 2:
        tile_b = _round_up(pl.cdiv(Bp0, 2), SUB)
    Bp = _round_up(B, tile_b)
    n_tiles = Bp // tile_b

    x_in = x
    if Bp != B:
        # Only when B isn't tile-aligned (small, cheap pad; no dtype cast pass).
        x_in = jnp.pad(x, ((0, Bp - B), (0, 0)))

    weight_args = (
        params["w1g"], params["w2g"],
        params["w1d"], params["w2d"],
        params["wf"], params["wc"],
        params["biases"],
    )

    x_spec = pl.BlockSpec((tile_b, D), lambda i: (i, 0))
    # Weights/biases: full-array blocks, constant index_map (resident in VMEM),
    # single-buffered -- nothing to pipeline, halves their VMEM footprint.
    w_specs = [
        pl.BlockSpec(w.shape, lambda i: (0, 0), pipeline_mode=pl.Buffered(1))
        for w in weight_args
    ]
    out_spec = pl.BlockSpec((tile_b, c_pad), lambda i: (i, 0))

    # ---- VMEM budget derived from the actual footprint ----
    weight_bytes = sum(int(a.size) * a.dtype.itemsize for a in weight_args)
    io_tile_bytes = 2 * (tile_b * D * x.dtype.itemsize + tile_b * c_pad * 2)  # dbl-buf
    live_f32_bytes = 8 * tile_b * max(2 * D, c_pad) * 4                       # intermediates
    vmem_limit = weight_bytes + io_tile_bytes + live_f32_bytes + (4 << 20)
    vmem_limit = int(min(max(vmem_limit, 32 << 20), 56 << 20))  # <=56 MiB: safe on v7x

    cost = pl.CostEstimate(
        flops=2 * Bp * (6 * D * D + D * c_pad),
        transcendentals=Bp,                       # one rsqrt per row
        bytes_accessed=Bp * D * x.dtype.itemsize + Bp * c_pad * 2 + weight_bytes,
    )

    kernel = _make_ufd_kernel(D, c_pad, split_wf=_is_v5e())

    logits_pad = pl.pallas_call(
        kernel,
        out_shape=jax.ShapeDtypeStruct((Bp, c_pad), jnp.bfloat16),
        grid=(n_tiles,),
        in_specs=[x_spec] + w_specs,
        out_specs=out_spec,
        compiler_params=pltpu.CompilerParams(
            dimension_semantics=("parallel",),
            vmem_limit_bytes=vmem_limit,
        ),
        cost_estimate=cost,
    )(x_in, *weight_args)

    return logits_pad[:B, :num_class].astype(jnp.float32)


def init_params(key, dim, num_class, initrange=0.1, c_pad=128):
    """Parameter init mimicking _init_weights: W ~ U(-initrange, initrange), b = 0.
    Weights stored (in_features, out_features) in bf16; all biases packed into a
    single (8, D_pack) f32 array (rows: b1g, b2g, b1d, b2d, bf, bc, 0, 0).
    Classifier weight/bias zero-padded to c_pad lane-dense output columns."""
    ks = jax.random.split(key, 7)
    u = lambda k, shape: jax.random.uniform(
        k, shape, dtype=jnp.float32, minval=-initrange, maxval=initrange
    ).astype(jnp.bfloat16)

    wc = jnp.zeros((dim, c_pad), jnp.bfloat16)
    wc = wc.at[:, :num_class].set(u(ks[6], (dim, num_class)))

    d_pack = max(dim, c_pad)
    biases = jnp.zeros((8, d_pack), jnp.float32)   # nn.Linear biases zero-initialized

    return {
        # adaptor_global: lin1 (dim->dim), lin2 (dim->dim)
        "w1g": u(ks[0], (dim, dim)), "w2g": u(ks[1], (dim, dim)),
        # adaptor_domain: lin1 (dim->dim), lin2 (dim->dim)
        "w1d": u(ks[2], (dim, dim)), "w2d": u(ks[3], (dim, dim)),
        # feature mapper: fc (2*dim -> dim), rows 0..dim-1 = global, dim..2dim-1 = domain
        "wf": jnp.concatenate([u(ks[4], (dim, dim)), u(ks[5], (dim, dim))], axis=0),
        # classifier: fc (dim -> num_class), zero-padded to c_pad columns
        "wc": wc,
        "biases": biases,
        "num_class": num_class,
        "dim": dim,
    }


def ufd_reference(x, p):
    """Pure-JAX f32 reference (uses the same bf16-rounded weight values)."""
    D = p["dim"]
    c_pad = p["wc"].shape[1]
    f = lambda w: w.astype(jnp.float32)
    relu = lambda t: jnp.maximum(t, 0.0)
    b = p["biases"]
    b1g, b2g, b1d, b2d = b[0, :D], b[1, :D], b[2, :D], b[3, :D]
    bfm, bc = b[4, :D], b[5, :c_pad]
    # adaptor_global
    h = relu(x @ f(p["w1g"]) + b1g)
    local_g = h + x
    g = relu(local_g @ f(p["w2g"]) + b2g) + local_g
    # adaptor_domain
    ld = relu(x) @ f(p["w1d"]) + b1d
    d = relu(ld @ f(p["w2d"]) + b2d)
    d = d / jnp.maximum(jnp.linalg.norm(d, axis=1, keepdims=True), 1e-12)
    # feature mapper + classifier
    feats = jnp.concatenate([g, d], axis=1)
    mapped = relu(feats) @ f(p["wf"]) + bfm
    logits = relu(mapped) @ f(p["wc"]) + bc
    return logits[:, : p["num_class"]]


if __name__ == "__main__":
    key = jax.random.PRNGKey(0)
    k_x, k_p, k_b = jax.random.split(key, 3)

    # Small shapes consistent with the module: in_dim = dim_hidden = out_dim =
    # embed_dim = D (the global adaptor's residuals require equal dims),
    # batch B, num_class C.
    B, D, C = 8, 128, 2

    x = jax.random.normal(k_x, (B, D), dtype=jnp.float32)
    params = init_params(k_p, D, C, initrange=0.1)
    # nn.Linear init zeroes the biases; set small nonzero biases here so the
    # bias-add path is actually exercised by the correctness check.
    params["biases"] = params["biases"].at[:6, :].set(
        0.05 * jax.random.normal(k_b, (6, params["biases"].shape[1]), jnp.float32)
    )

    logits = ufd_model_forward(x, params)
    logits = jax.block_until_ready(logits)

    ref = ufd_reference(x, params)
    assert logits.shape == (B, C), logits.shape
    max_err = float(jnp.max(jnp.abs(logits - ref)))
    # bf16 matmul operands + bf16 logits writeback (f32 accumulation) vs a
    # pure-f32 activation reference.
    assert jnp.allclose(logits, ref, atol=5e-2, rtol=5e-2), (
        f"mismatch vs reference: max abs err = {max_err}"
    )

    # TODO(synk): CrossEntropyLoss on logits.view(-1) (labels path) is not
    # implemented; inference path (labels=None) only.
    print("KERNEL_OK")
</pallas_src>

<mosaic_0001>
module attributes {stable_mosaic.version = 11 : i64} {
  func.func @ufd_kernel(%arg0: i32, %arg1: memref<16x128xf32, #tpu.memory_space<vmem>>, %arg2: memref<128x128xbf16, #tpu.memory_space<vmem>>, %arg3: memref<128x128xbf16, #tpu.memory_space<vmem>>, %arg4: memref<128x128xbf16, #tpu.memory_space<vmem>>, %arg5: memref<128x128xbf16, #tpu.memory_space<vmem>>, %arg6: memref<256x128xbf16, #tpu.memory_space<vmem>>, %arg7: memref<128x128xbf16, #tpu.memory_space<vmem>>, %arg8: memref<8x128xf32, #tpu.memory_space<vmem>>, %arg9: memref<16x128xbf16, #tpu.memory_space<vmem>>) attributes {dimension_semantics = [#tpu.dimension_semantics<parallel>], iteration_bounds = array<i64: 1>, scalar_prefetch = 0 : i64, scratch_operands = 0 : i64, tpu.core_type = #tpu.core_type<tc>, window_params = [{transform_indices = @transform_0, window_bounds = array<i64: 16, 128>}, {pipeline_mode = #tpu.pipeline_mode<synchronous>, transform_indices = @transform_1, window_bounds = array<i64: 128, 128>}, {pipeline_mode = #tpu.pipeline_mode<synchronous>, transform_indices = @transform_2, window_bounds = array<i64: 128, 128>}, {pipeline_mode = #tpu.pipeline_mode<synchronous>, transform_indices = @transform_3, window_bounds = array<i64: 128, 128>}, {pipeline_mode = #tpu.pipeline_mode<synchronous>, transform_indices = @transform_4, window_bounds = array<i64: 128, 128>}, {pipeline_mode = #tpu.pipeline_mode<synchronous>, transform_indices = @transform_5, window_bounds = array<i64: 256, 128>}, {pipeline_mode = #tpu.pipeline_mode<synchronous>, transform_indices = @transform_6, window_bounds = array<i64: 128, 128>}, {pipeline_mode = #tpu.pipeline_mode<synchronous>, transform_indices = @transform_7, window_bounds = array<i64: 8, 128>}, {transform_indices = @transform_8, window_bounds = array<i64: 16, 128>}]} {
    %c0 = arith.constant 0 : index
    %c0_0 = arith.constant 0 : index
    %0 = vector.load %arg1[%c0, %c0_0] : memref<16x128xf32, #tpu.memory_space<vmem>>, vector<16x128xf32>
    %1 = arith.truncf %0 : vector<16x128xf32> to vector<16x128xbf16>
    %c0_1 = arith.constant 0 : index
    %c0_2 = arith.constant 0 : index
    %2 = vector.load %arg8[%c0_1, %c0_2] : memref<8x128xf32, #tpu.memory_space<vmem>>, vector<8x128xf32>
    %3 = vector.extract_strided_slice %2 {offsets = [0, 0], sizes = [1, 128], strides = [1, 1]} : vector<8x128xf32> to vector<1x128xf32>
    %4 = vector.extract_strided_slice %2 {offsets = [1, 0], sizes = [1, 128], strides = [1, 1]} : vector<8x128xf32> to vector<1x128xf32>
    %5 = vector.extract_strided_slice %2 {offsets = [2, 0], sizes = [1, 128], strides = [1, 1]} : vector<8x128xf32> to vector<1x128xf32>
    %6 = vector.extract_strided_slice %2 {offsets = [3, 0], sizes = [1, 128], strides = [1, 1]} : vector<8x128xf32> to vector<1x128xf32>
    %7 = vector.extract_strided_slice %2 {offsets = [4, 0], sizes = [1, 128], strides = [1, 1]} : vector<8x128xf32> to vector<1x128xf32>
    %8 = vector.extract_strided_slice %2 {offsets = [5, 0], sizes = [1, 128], strides = [1, 1]} : vector<8x128xf32> to vector<1x128xf32>
    %c0_3 = arith.constant 0 : index
    %c0_4 = arith.constant 0 : index
    %9 = vector.load %arg2[%c0_3, %c0_4] : memref<128x128xbf16, #tpu.memory_space<vmem>>, vector<128x128xbf16>
    %cst = arith.constant dense<0.000000e+00> : vector<16x128xf32>
    %10 = tpu.matmul %1, %9, %cst {dimension_numbers = #tpu.dot_dimension_numbers<[1], [0], [0], [1], [0, 0, 1, 1], [], []>} : vector<16x128xbf16>, vector<128x128xbf16>, vector<16x128xf32> -> vector<16x128xf32>
    %11 = vector.broadcast %3 : vector<1x128xf32> to vector<16x128xf32>
    %12 = arith.addf %10, %11 : vector<16x128xf32>
    %cst_5 = arith.constant 0.000000e+00 : f32
    %13 = vector.broadcast %cst_5 : f32 to vector<16x128xf32>
    %14 = arith.maximumf %12, %13 : vector<16x128xf32>
    %15 = arith.addf %14, %0 : vector<16x128xf32>
    %16 = arith.truncf %15 : vector<16x128xf32> to vector<16x128xbf16>
    %c0_6 = arith.constant 0 : index
    %c0_7 = arith.constant 0 : index
    %17 = vector.load %arg3[%c0_6, %c0_7] : memref<128x128xbf16, #tpu.memory_space<vmem>>, vector<128x128xbf16>
    %cst_8 = arith.constant dense<0.000000e+00> : vector<16x128xf32>
    %18 = tpu.matmul %16, %17, %cst_8 {dimension_numbers = #tpu.dot_dimension_numbers<[1], [0], [0], [1], [0, 0, 1, 1], [], []>} : vector<16x128xbf16>, vector<128x128xbf16>, vector<16x128xf32> -> vector<16x128xf32>
    %19 = vector.broadcast %4 : vector<1x128xf32> to vector<16x128xf32>
    %20 = arith.addf %18, %19 : vector<16x128xf32>
    %cst_9 = arith.constant 0.000000e+00 : f32
    %21 = vector.broadcast %cst_9 : f32 to vector<16x128xf32>
    %22 = arith.maximumf %20, %21 : vector<16x128xf32>
    %23 = arith.addf %22, %15 : vector<16x128xf32>
    %cst_10 = arith.constant 0.000000e+00 : bf16
    %24 = vector.broadcast %cst_10 : bf16 to vector<16x128xbf16>
    %25 = arith.maximumf %1, %24 : vector<16x128xbf16>
    %c0_11 = arith.constant 0 : index
    %c0_12 = arith.constant 0 : index
    %26 = vector.load %arg4[%c0_11, %c0_12] : memref<128x128xbf16, #tpu.memory_space<vmem>>, vector<128x128xbf16>
    %cst_13 = arith.constant dense<0.000000e+00> : vector<16x128xf32>
    %27 = tpu.matmul %25, %26, %cst_13 {dimension_numbers = #tpu.dot_dimension_numbers<[1], [0], [0], [1], [0, 0, 1, 1], [], []>} : vector<16x128xbf16>, vector<128x128xbf16>, vector<16x128xf32> -> vector<16x128xf32>
    %28 = vector.broadcast %5 : vector<1x128xf32> to vector<16x128xf32>
    %29 = arith.addf %27, %28 : vector<16x128xf32>
    %30 = arith.truncf %29 : vector<16x128xf32> to vector<16x128xbf16>
    %c0_14 = arith.constant 0 : index
    %c0_15 = arith.constant 0 : index
    %31 = vector.load %arg5[%c0_14, %c0_15] : memref<128x128xbf16, #tpu.memory_space<vmem>>, vector<128x128xbf16>
    %cst_16 = arith.constant dense<0.000000e+00> : vector<16x128xf32>
    %32 = tpu.matmul %30, %31, %cst_16 {dimension_numbers = #tpu.dot_dimension_numbers<[1], [0], [0], [1], [0, 0, 1, 1], [], []>} : vector<16x128xbf16>, vector<128x128xbf16>, vector<16x128xf32> -> vector<16x128xf32>
    %33 = vector.broadcast %6 : vector<1x128xf32> to vector<16x128xf32>
    %34 = arith.addf %32, %33 : vector<16x128xf32>
    %cst_17 = arith.constant 0.000000e+00 : f32
    %35 = vector.broadcast %cst_17 : f32 to vector<16x128xf32>
    %36 = arith.maximumf %34, %35 : vector<16x128xf32>
    %37 = arith.mulf %36, %36 : vector<16x128xf32>
    %cst_18 = arith.constant dense<0.000000e+00> : vector<16xf32>
    %38 = vector.multi_reduction <add>, %37, %cst_18 [1] : vector<16x128xf32> to vector<16xf32>
    %39 = vector.shape_cast %38 : vector<16xf32> to vector<16x1xf32>
    %cst_19 = arith.constant 1.000000e-24 : f32
    %40 = vector.broadcast %cst_19 : f32 to vector<16x1xf32>
    %41 = arith.maximumf %39, %40 : vector<16x1xf32>
    %42 = math.rsqrt %41 : vector<16x1xf32>
    %43 = vector.broadcast %42 : vector<16x1xf32> to vector<16x128xf32>
    %44 = arith.mulf %36, %43 : vector<16x128xf32>
    %cst_20 = arith.constant 0.000000e+00 : f32
    %45 = vector.broadcast %cst_20 : f32 to vector<16x128xf32>
    %46 = arith.maximumf %23, %45 : vector<16x128xf32>
    %47 = arith.truncf %46 : vector<16x128xf32> to vector<16x128xbf16>
    %48 = arith.truncf %44 : vector<16x128xf32> to vector<16x128xbf16>
    %49 = tpu.concatenate %47, %48 in 1 : vector<16x128xbf16>, vector<16x128xbf16> -> vector<16x256xbf16>
    %c0_21 = arith.constant 0 : index
    %c0_22 = arith.constant 0 : index
    %50 = vector.load %arg6[%c0_21, %c0_22] : memref<256x128xbf16, #tpu.memory_space<vmem>>, vector<256x128xbf16>
    %cst_23 = arith.constant dense<0.000000e+00> : vector<16x128xf32>
    %51 = tpu.matmul %49, %50, %cst_23 {dimension_numbers = #tpu.dot_dimension_numbers<[1], [0], [0], [1], [0, 0, 1, 1], [], []>} : vector<16x256xbf16>, vector<256x128xbf16>, vector<16x128xf32> -> vector<16x128xf32>
    %52 = vector.broadcast %7 : vector<1x128xf32> to vector<16x128xf32>
    %53 = arith.addf %51, %52 : vector<16x128xf32>
    %cst_24 = arith.constant 0.000000e+00 : f32
    %54 = vector.broadcast %cst_24 : f32 to vector<16x128xf32>
    %55 = arith.maximumf %53, %54 : vector<16x128xf32>
    %56 = arith.truncf %55 : vector<16x128xf32> to vector<16x128xbf16>
    %c0_25 = arith.constant 0 : index
    %c0_26 = arith.constant 0 : index
    %57 = vector.load %arg7[%c0_25, %c0_26] : memref<128x128xbf16, #tpu.memory_space<vmem>>, vector<128x128xbf16>
    %cst_27 = arith.constant dense<0.000000e+00> : vector<16x128xf32>
    %58 = tpu.matmul %56, %57, %cst_27 {dimension_numbers = #tpu.dot_dimension_numbers<[1], [0], [0], [1], [0, 0, 1, 1], [], []>} : vector<16x128xbf16>, vector<128x128xbf16>, vector<16x128xf32> -> vector<16x128xf32>
    %59 = vector.broadcast %8 : vector<1x128xf32> to vector<16x128xf32>
    %60 = arith.addf %58, %59 : vector<16x128xf32>
    %61 = arith.truncf %60 : vector<16x128xf32> to vector<16x128xbf16>
    %c0_28 = arith.constant 0 : index
    %c0_29 = arith.constant 0 : index
    %62 = vector.load %arg9[%c0_28, %c0_29] : memref<16x128xbf16, #tpu.memory_space<vmem>>, vector<16x128xbf16>
    tpu.vector_store %arg9[%c0_28, %c0_29], %61 {strides = array<i32>} : memref<16x128xbf16, #tpu.memory_space<vmem>>, vector<16x128xbf16>,
    return
  }
  func.func @transform_0(%arg0: i32) -> (i32, i32) {
    %c0_i32 = arith.constant 0 : i32
    %c0_i32_0 = arith.constant 0 : i32
    return %arg0, %c0_i32 : i32, i32
  }
  func.func @transform_1(%arg0: i32) -> (i32, i32) {
    %c0_i32 = arith.constant 0 : i32
    %c0_i32_0 = arith.constant 0 : i32
    %c0_i32_1 = arith.constant 0 : i32
    return %c0_i32, %c0_i32_0 : i32, i32
  }
  func.func @transform_2(%arg0: i32) -> (i32, i32) {
    %c0_i32 = arith.constant 0 : i32
    %c0_i32_0 = arith.constant 0 : i32
    %c0_i32_1 = arith.constant 0 : i32
    return %c0_i32, %c0_i32_0 : i32, i32
  }
  func.func @transform_3(%arg0: i32) -> (i32, i32) {
    %c0_i32 = arith.constant 0 : i32
    %c0_i32_0 = arith.constant 0 : i32
    %c0_i32_1 = arith.constant 0 : i32
    return %c0_i32, %c0_i32_0 : i32, i32
  }
  func.func @transform_4(%arg0: i32) -> (i32, i32) {
    %c0_i32 = arith.constant 0 : i32
    %c0_i32_0 = arith.constant 0 : i32
    %c0_i32_1 = arith.constant 0 : i32
    return %c0_i32, %c0_i32_0 : i32, i32
  }
  func.func @transform_5(%arg0: i32) -> (i32, i32) {
    %c0_i32 = arith.constant 0 : i32
    %c0_i32_0 = arith.constant 0 : i32
    %c0_i32_1 = arith.constant 0 : i32
    return %c0_i32, %c0_i32_0 : i32, i32
  }
  func.func @transform_6(%arg0: i32) -> (i32, i32) {
    %c0_i32 = arith.constant 0 : i32
    %c0_i32_0 = arith.constant 0 : i32
    %c0_i32_1 = arith.constant 0 : i32
    return %c0_i32, %c0_i32_0 : i32, i32
  }
  func.func @transform_7(%arg0: i32) -> (i32, i32) {
    %c0_i32 = arith.constant 0 : i32
    %c0_i32_0 = arith.constant 0 : i32
    %c0_i32_1 = arith.constant 0 : i32
    return %c0_i32, %c0_i32_0 : i32, i32
  }
  func.func @transform_8(%arg0: i32) -> (i32, i32) {
    %c0_i32 = arith.constant 0 : i32
    %c0_i32_0 = arith.constant 0 : i32
    return %arg0, %c0_i32 : i32, i32
  }
}

</mosaic_0001>

<bundles_post_ra>
// kernel: tpu_custom_call.1
= control target key start
LH: loop header
LB: loop body
LE: loop exit
PB: predicated region body
PF: predicated region fallthrough
CT: control target
= control target key end

     0   :  { %13 = vsyncpa [#allocation3], 0  ;;  %s1455_s0 = inlined_call_operand.hbm [shape: f32[16,128], index: 0, kind: input, shape index: {}]   ;;  %s1456_s1 = inlined_call_operand.hbm [shape: bf16[128,128], index: 1, kind: input, shape index: {}]   ;;  %s1457_s2 = inlined_call_operand.hbm [shape: bf16[128,128], index: 2, kind: input, shape index: {}]   ;;  %s1458_s3 = inlined_call_operand.hbm [shape: bf16[128,128], index: 3, kind: input, shape index: {}]   ;;  %s1459_s4 = inlined_call_operand.hbm [shape: bf16[128,128], index: 4, kind: input, shape index: {}]   ;;  %s1460_s5 = inlined_call_operand.hbm [shape: bf16[256,128], index: 5, kind: input, shape index: {}]   ;;  %s1461_s6 = inlined_call_operand.hbm [shape: bf16[128,128], index: 6, kind: input, shape index: {}]   ;;  %s1462_s7 = inlined_call_operand.hbm [shape: f32[8,128], index: 7, kind: input, shape index: {}]   ;;  %s1463_s8 = inlined_call_operand.hbm [shape: bf16[16,128], index: 8, kind: output, shape index: {}]  }
   0x1   :  { %14 = vsyncpa [#allocation6], 0 }
   0x2   :  { %15 = vsyncpa [#allocation9], 0 }
   0x3   :  { %16 = vsyncpa [#allocation12], 0 }
   0x4   :  { %17 = vsyncpa [#allocation15], 0  ;;  %s36_s29 = sshll.u32 %s1456_s1, 4  ;;  %s37_s29 = int_to_ptr.hbm [resolvable:$true] %s36_s29 }
   0x5   :  { %18 = vsyncpa [#allocation4], 0  ;;  %s1341_s30 = smov [#allocation5]   ;;  %s62_s12 = sshll.u32 %s1458_s3, 4  ;;  %s63_s12 = int_to_ptr.hbm [resolvable:$true] %s62_s12 }
   0x6   :  { %s38_s9 = sshll.u32 %s1341_s30, 4  ;;  %s1342_s13 = smov 64   ;;  %s39_s9 = int_to_ptr.vmem [resolvable:$true] %s38_s9 }
   0x7   :  { %s1343_s14 = smov 4   ;;  %s1344_s15 = smov [#allocation8]  }
   0x8   :  { %44 = dma.hbm_to_vmem [thread:$0]  %s37_s29, 1024, %s39_s9, [#allocation6], %s1342_s13, %s1342_s13, %s1343_s14  }
   0x9   :  { %s64_s16 = sshll.u32 %s1344_s15, 4  ;;  %s88_s18 = sshll.u32 %s1460_s5, 4  ;;  %s65_s16 = int_to_ptr.vmem [resolvable:$true] %s64_s16  ;;  %s89_s18 = int_to_ptr.hbm [resolvable:$true] %s88_s18 }
   0xa   :  { %70 = dma.hbm_to_vmem [thread:$0]  %s63_s12, 1024, %s65_s16, [#allocation9], %s1342_s13, %s1342_s13, %s1343_s14  }
   0xb   :  { %s23_s20 = sshll.u32 %s1455_s0, 4  ;;  %s1345_s21 = smov [#allocation11]   ;;  %s24_s20 = int_to_ptr.hbm [resolvable:$true] %s23_s20 }
   0xc   :  { %s90_s22 = sshll.u32 %s1345_s21, 4  ;;  %s1346_s23 = smov [#allocation2]   ;;  %s91_s22 = int_to_ptr.vmem [resolvable:$true] %s90_s22 }
   0xd   :  { %96 = dma.hbm_to_vmem [thread:$0]  %s89_s18, 2048, %s91_s22, [#allocation12], %s1342_s13, %s1342_s13, %s1343_s14  }
   0xe   :  { %s25_s5 = sshll.u32 %s1346_s23, 4  ;;  %s1347_s24 = smov 128   ;;  %s26_s5 = int_to_ptr.vmem [resolvable:$true] %s25_s5 }
   0xf   :  { %s1348_s25 = smov 8   ;;  %s49_s28 = sshll.u32 %s1457_s2, 4  ;;  %s50_s28 = int_to_ptr.hbm [resolvable:$true] %s49_s28 }
  0x10   :  { %31 = dma.hbm_to_vmem [thread:$0]  %s24_s20, 256, %s26_s5, [#allocation3], %s1347_s24, %s1347_s24, %s1348_s25  }
  0x11   :  { %s1349_s0 = smov [#allocation7]   ;;  %s75_s10 = sshll.u32 %s1459_s4, 4  ;;  %s76_s10 = int_to_ptr.hbm [resolvable:$true] %s75_s10 }
  0x12   :  { %s51_s29 = sshll.u32 %s1349_s0, 4  ;;  %s1350_s11 = smov [#allocation10]   ;;  %s52_s29 = int_to_ptr.vmem [resolvable:$true] %s51_s29 }
  0x13   :  { %57 = dma.hbm_to_vmem [thread:$0]  %s50_s28, 1024, %s52_s29, [#allocation6], %s1342_s13, %s1342_s13, %s1343_s14  }
  0x14   :  { %s77_s12 = sshll.u32 %s1350_s11, 4  ;;  %s101_s17 = sshll.u32 %s1461_s6, 4  ;;  %s78_s12 = int_to_ptr.vmem [resolvable:$true] %s77_s12  ;;  %s102_s17 = int_to_ptr.hbm [resolvable:$true] %s101_s17 }
  0x15   :  { %83 = dma.hbm_to_vmem [thread:$0]  %s76_s10, 1024, %s78_s12, [#allocation9], %s1342_s13, %s1342_s13, %s1343_s14  }
  0x16   :  { %s115_s4 = sshll.u32 %s1462_s7, 4  ;;  %s1351_s18 = smov [#allocation13]   ;;  %s116_s4 = int_to_ptr.hbm [resolvable:$true] %s115_s4 }
  0x17   :  { %s103_s3 = sshll.u32 %s1351_s18, 4  ;;  %s1352_s19 = smov [#allocation14]   ;;  %s104_s3 = int_to_ptr.vmem [resolvable:$true] %s103_s3 }
  0x18   :  { %109 = dma.hbm_to_vmem [thread:$0]  %s102_s17, 1024, %s104_s3, [#allocation12], %s1342_s13, %s1342_s13, %s1343_s14  }
  0x19   :  { %s117_s6 = sshll.u32 %s1352_s19, 4  ;;  %s118_s6 = int_to_ptr.vmem [resolvable:$true] %s117_s6 }
  0x1a   :  { %120 = dma.hbm_to_vmem [thread:$0]  %s116_s4, 128, %s118_s6, [#allocation15]  }
  0x1b   :  { %1329 = dma.done.wait [#allocation3], 256  }
  0x1c   :  { %1330 = vsyncadd [#allocation3], 4294967040 }
  0x1d   :  { %1331 = dma.done.wait [#allocation6], 2048  }
  0x1e   :  { %1332 = vsyncadd [#allocation6], 4294965248 }
  0x1f   :  { %1333 = dma.done.wait [#allocation9], 2048  }
  0x20   :  { %1334 = vsyncadd [#allocation9], 4294965248 }
  0x21   :  { %1335 = dma.done.wait [#allocation12], 3072  }
  0x22   :  { %1336 = vsyncadd [#allocation12], 4294964224 }
  0x23   :  { %1337 = dma.done.wait [#allocation15], 128  }
  0x24   :  { %1338 = vsyncadd [#allocation15], 4294967168  ;;  %v1042_v0 = vld [vmem:[#allocation5 + $0x38] sm:$0xff]  ;;  %v1041_v2 = vld [vmem:[#allocation5 + $0x30] sm:$0xff]  ;;  %s1353_s7 = smov [#allocation16]   ;;  %s794_s23 = sshll.u32 %s1463_s8, 4  ;;  %s795_s23 = int_to_ptr.hbm [resolvable:$true] %s794_s23 }
  0x25   :  { %v1058_v1 = vld [vmem:[#allocation8 + $0x38] sm:$0xff]  ;;  %229 = vmatpush.bf16.msra.mxu0 %v1042_v0  ;;  %v1057_v3 = vld [vmem:[#allocation8 + $0x30] sm:$0xff]  ;;  %v1040_v4 = vld [vmem:[#allocation5 + $0x28] sm:$0xff]  ;;  %s792_s20 = sshll.u32 %s1353_s7, 4  ;;  %s793_s20 = int_to_ptr.vmem [resolvable:$true] %s792_s20 }
  0x26   :  { %401 = vmatpush.bf16.msra.mxu2 %v1058_v1  ;;  %v1056_v5 = vld [vmem:[#allocation8 + $0x28] sm:$0xff]  ;;  %v1050_v6 = vld [vmem:[#allocation7 + $0x38] sm:$0xff]  ;;  %v1049_v8 = vld [vmem:[#allocation7 + $0x30] sm:$0xff] }
  0x27   :  { %v1066_v7 = vld [vmem:[#allocation10 + $0x38] sm:$0xff]  ;;  %313 = vmatpush.bf16.msra.mxu1 %v1050_v6  ;;  %v1065_v9 = vld [vmem:[#allocation10 + $0x30] sm:$0xff]  ;;  %v1039_v10 = vld [vmem:[#allocation5 + $0x20] sm:$0xff] }
  0x28   :  { %481 = vmatpush.bf16.msra.mxu3 %v1066_v7  ;;  %v1055_v11 = vld [vmem:[#allocation8 + $0x20] sm:$0xff]  ;;  %v1048_v12 = vld [vmem:[#allocation7 + $0x28] sm:$0xff]  ;;  %v1038_v14 = vld [vmem:[#allocation5 + $0x18] sm:$0xff] }
  0x29   :  { %230 = vmatpush.bf16.msra.mxu0 %v1041_v2  ;;  %v1064_v13 = vld [vmem:[#allocation10 + $0x28] sm:$0xff]  ;;  %v1054_v15 = vld [vmem:[#allocation8 + $0x18] sm:$0xff]  ;;  %v1047_v16 = vld [vmem:[#allocation7 + $0x20] sm:$0xff] }
  0x2a   :  { %402 = vmatpush.bf16.msra.mxu2 %v1057_v3  ;;  %v1037_v17 = vld [vmem:[#allocation5 + $0x10] sm:$0xff]  ;;  %v154_v20 = vld [vmem:[#allocation2 + $0x8] sm:$0xff]  ;;  %v1036_v23 = vld [vmem:[#allocation5 + $0x8] sm:$0xff] }
  0x2b   :  { %314 = vmatpush.bf16.msra.mxu1 %v1049_v8  ;;  %v1053_v18 = vld [vmem:[#allocation8 + $0x10] sm:$0xff]  ;;  %v156_v22 = vpack.c.bf16 %v154_v20, %v154_v20  ;;  %v1052_v24 = vld [vmem:[#allocation8 + $0x8] sm:$0xff]  ;;  %v334_v28 = vmax.f32 %v154_v20, 0.0  ;;  %v1035_v29 = vld [vmem:[#allocation5] sm:$0xff] }
  0x2c   :  { %482 = vmatpush.bf16.msra.mxu3 %v1065_v9  ;;  %v153_v19 = vld [vmem:[#allocation2] sm:$0xff]  ;;  %v1051_v30 = vld [vmem:[#allocation8] sm:$0xff]  ;;  %v1046_v34 = vld [vmem:[#allocation7 + $0x18] sm:$0xff] }
  0x2d   :  { %231 = vmatpush.bf16.msra.mxu0 %v1040_v4  ;;  %v155_v21 = vpack.c.bf16 %v153_v19, %v153_v19  ;;  %v178_v26 = vunpack.c.l.b16 %v156_v22  ;;  %v333_v27 = vmax.f32 %v153_v19, 0.0  ;;  %v1063_v33 = vld [vmem:[#allocation10 + $0x20] sm:$0xff]  ;;  %v1062_v35 = vld [vmem:[#allocation10 + $0x18] sm:$0xff]  ;;  %v1045_v36 = vld [vmem:[#allocation7 + $0x10] sm:$0xff] }
  0x2e   :  { %403 = vmatpush.bf16.msra.mxu2 %v1056_v5  ;;  %v1061_v37 = vld [vmem:[#allocation10 + $0x10] sm:$0xff]  ;;  %v1044_v38 = vld [vmem:[#allocation7 + $0x8] sm:$0xff]  ;;  %v1043_v40 = vld [vmem:[#allocation7] sm:$0xff] }
  0x2f   :  { %315 = vmatpush.bf16.msra.mxu1 %v1048_v12  ;;  %v177_v25 = vunpack.c.l.b16 %v155_v21  ;;  %v335_v32 = vpack.c.bf16 %v334_v28, %v333_v27  ;;  %v1060_v39 = vld [vmem:[#allocation10 + $0x8] sm:$0xff]  ;;  %v1059_v41 = vld [vmem:[#allocation10] sm:$0xff]  ;;  %v1074_v42 = vld [vmem:[#allocation11 + $0x38] sm:$0xff] }
  0x30   :  { %483 = vmatpush.bf16.msra.mxu3 %v1064_v13  ;;  %v1073_v43 = vld [vmem:[#allocation11 + $0x30] sm:$0xff]  ;;  %v1441_v44 = vld [vmem:[#allocation14] sm:$0xff]  ;;  %v1072_v61 = vld [vmem:[#allocation11 + $0x28] sm:$0xff] }
  0x31   :  { %232 = vmatpush.bf16.msra.mxu0 %v1039_v10  ;;  %v179_v31 = vpack.c.b16 %v178_v26, %v177_v25  ;;  %v174_v45 = vperm.slane %v1441_v44, 0  ;;  %v352_v53 = vperm.slane %v1441_v44, 2  ;;  %v1071_v62 = vld [vmem:[#allocation11 + $0x20] sm:$0xff]  ;;  %v1070_v63 = vld [vmem:[#allocation11 + $0x18] sm:$0xff]  ;;  %v1069_v0 = vld [vmem:[#allocation11 + $0x10] sm:$0xff]  ;;  %v264_v3 = vperm.slane %v1441_v44, 1 }
  0x32   :  { %404 = vmatpush.bf16.msra.mxu2 %v1055_v11  ;;  %v1068_v1 = vld [vmem:[#allocation11 + $0x8] sm:$0xff]  ;;  %v1067_v2 = vld [vmem:[#allocation11] sm:$0xff]  ;;  %v432_v7 = vperm.slane %v1441_v44, 3  ;;  %v1082_v28 = vld [vmem:[#allocation11 + $0x78] sm:$0xff] }
  0x33   :  { %316 = vmatpush.bf16.msra.mxu1 %v1047_v16 }
  0x34   :  { %484 = vmatpush.bf16.msra.mxu3 %v1063_v33  ;;  %v1077_v33 = vld [vmem:[#allocation11 + $0x50] sm:$0xff] }
  0x35   :  { %233 = vmatpush.bf16.msra.mxu0 %v1038_v14 }
  0x36   :  { %405 = vmatpush.bf16.msra.mxu2 %v1054_v15 }
  0x37   :  { %317 = vmatpush.bf16.msra.mxu1 %v1046_v34  ;;  %v1076_v34 = vld [vmem:[#allocation11 + $0x48] sm:$0xff] }
  0x38   :  { %485 = vmatpush.bf16.msra.mxu3 %v1062_v35  ;;  %v1075_v35 = vld [vmem:[#allocation11 + $0x40] sm:$0xff] }
  0x39   :  { %234 = vmatpush.bf16.msra.mxu0 %v1037_v17 }
  0x3a   :  { %406 = vmatpush.bf16.msra.mxu2 %v1053_v18 }
  0x3b   :  { %318 = vmatpush.bf16.msra.mxu1 %v1045_v36 }
  0x3c   :  { %486 = vmatpush.bf16.msra.mxu3 %v1061_v37 }
  0x3d   :  { %235 = vmatpush.bf16.msra.mxu0 %v1036_v23 }
  0x3e   :  { %407 = vmatpush.bf16.msra.mxu2 %v1052_v24 }
  0x3f   :  { %319 = vmatpush.bf16.msra.mxu1 %v1044_v38  ;;  %v1090_v38 = vld [vmem:[#allocation13 + $0x38] sm:$0xff] }
  0x40   :  { %487 = vmatpush.bf16.msra.mxu3 %v1060_v39  ;;  %v1089_v39 = vld [vmem:[#allocation13 + $0x30] sm:$0xff] }
  0x41   :  { %236 = vmatpush.bf16.msra.mxu0 %v1035_v29  ;;  %v1081_v29 = vld [vmem:[#allocation11 + $0x70] sm:$0xff] }
  0x42   :  { %408 = vmatpush.bf16.msra.mxu2 %v1051_v30  ;;  %v1080_v30 = vld [vmem:[#allocation11 + $0x68] sm:$0xff] }
  0x43   :  { %320 = vmatpush.bf16.msra.mxu1 %v1043_v40 }
  0x44   :  { %237 = vmatmul.bf16.vlgmr.msra.gmra.mxu0 %v179_v31  ;;  %488 = vmatpush.bf16.msra.mxu3 %v1059_v41  ;;  %v1079_v31 = vld [vmem:[#allocation11 + $0x60] sm:$0xff] }
  0x45   :  { %409 = vmatmul.bf16.vlgmr.msra.gmra.mxu2 %v335_v32  ;;  %674 = vmatpush.bf16.msrb.mxu0 %v1074_v42  ;;  %v1078_v32 = vld [vmem:[#allocation11 + $0x58] sm:$0xff] }
  0x46   :  { %770 = vmatpush.bf16.msrb.mxu2 %v1090_v38 }
  0x47   :  { %688 = vmatpush.bf16.msrb.mxu1 %v1082_v28 }
  0x49   :  { %675 = vmatpush.bf16.msrb.mxu0 %v1073_v43 }
  0x4a   :  { %771 = vmatpush.bf16.msrb.mxu2 %v1089_v39 }
  0x4b   :  { %689 = vmatpush.bf16.msrb.mxu1 %v1081_v29 }
  0x4d   :  { %676 = vmatpush.bf16.msrb.mxu0 %v1072_v61 }
  0x4f   :  { %690 = vmatpush.bf16.msrb.mxu1 %v1080_v30 }
  0x51   :  { %677 = vmatpush.bf16.msrb.mxu0 %v1071_v62 }
  0x53   :  { %691 = vmatpush.bf16.msrb.mxu1 %v1079_v31 }
  0x55   :  { %678 = vmatpush.bf16.msrb.mxu0 %v1070_v63 }
  0x57   :  { %692 = vmatpush.bf16.msrb.mxu1 %v1078_v32 }
  0x59   :  { %679 = vmatpush.bf16.msrb.mxu0 %v1069_v0 }
  0x5b   :  { %693 = vmatpush.bf16.msrb.mxu1 %v1077_v33 }
  0x5d   :  { %680 = vmatpush.bf16.msrb.mxu0 %v1068_v1 }
  0x5f   :  { %694 = vmatpush.bf16.msrb.mxu1 %v1076_v34 }
  0x61   :  { %681 = vmatpush.bf16.msrb.mxu0 %v1067_v2  ;;  %v1086_v2 = vld [vmem:[#allocation13 + $0x18] sm:$0xff] }
  0x63   :  { %695 = vmatpush.bf16.msrb.mxu1 %v1075_v35 }
  0xc1   :  { %v238_v46 = vpop.f32.mrf.mxu0 }
  0xc2   :  { %v239_v47 = vadd.f32 %v238_v46, %v174_v45 }
  0xc4   :  { %v243_v49 = vmax.f32 %v239_v47, 0.0 }
  0xc6   :  { %v245_v52 = vadd.f32 %v243_v49, %v153_v19 }
  0xc8   :  { %v410_v48 = vpop.f32.mrf.mxu2 }
  0xc9   :  { %v240_v50 = vpop.f32.mrf.mxu0  ;;  %v411_v57 = vadd.f32 %v410_v48, %v352_v53  ;;  %v1087_v48 = vld [vmem:[#allocation13 + $0x20] sm:$0xff] }
  0xca   :  { %v241_v51 = vadd.f32 %v240_v50, %v174_v45  ;;  %v1088_v45 = vld [vmem:[#allocation13 + $0x28] sm:$0xff] }
  0xcb   :  { %772 = vmatpush.bf16.msrb.mxu2 %v1088_v45 }
  0xcc   :  { %v244_v54 = vmax.f32 %v241_v51, 0.0 }
  0xce   :  { %v246_v55 = vadd.f32 %v244_v54, %v154_v20 }
  0xcf   :  { %773 = vmatpush.bf16.msrb.mxu2 %v1087_v48 }
  0xd0   :  { %v412_v56 = vpop.f32.mrf.mxu2  ;;  %v247_v59 = vpack.c.bf16 %v246_v55, %v245_v52 }
  0xd1   :  { %v413_v58 = vadd.f32 %v412_v56, %v352_v53 }
  0xd2   :  { %321 = vmatmul.bf16.vlgmr.msra.gmra.mxu1 %v247_v59 }
  0xd3   :  { %v415_v60 = vpack.c.bf16 %v413_v58, %v411_v57  ;;  %774 = vmatpush.bf16.msrb.mxu2 %v1086_v2 }
  0xd5   :  { %489 = vmatmul.bf16.vlgmr.msra.gmra.mxu3 %v415_v60 }
 0x14f   :  { %v322_v4 = vpop.f32.mrf.mxu1 }
 0x150   :  { %v323_v5 = vadd.f32 %v322_v4, %v264_v3  ;;  %v1084_v4 = vld [vmem:[#allocation13 + $0x8] sm:$0xff] }
 0x152   :  { %v327_v6 = vmax.f32 %v323_v5, 0.0  ;;  %v1083_v5 = vld [vmem:[#allocation13] sm:$0xff] }
 0x154   :  { %v329_v8 = vadd.f32 %v327_v6, %v245_v52 }
 0x156   :  { %v527_v13 = vmax.f32 %v329_v8, 0.0  ;;  %v577_v8 = vperm.slane %v1441_v44, 4 }
 0x157   :  { %v324_v9 = vpop.f32.mrf.mxu1 }
 0x158   :  { %v490_v10 = vpop.f32.mrf.mxu3  ;;  %v325_v11 = vadd.f32 %v324_v9, %v264_v3  ;;  %v529_v18 = vpack.c.bf16 %v527_v13, %v527_v13  ;;  %v1085_v3 = vld [vmem:[#allocation13 + $0x10] sm:$0xff] }
 0x159   :  { %v491_v12 = vadd.f32 %v490_v10, %v432_v7  ;;  %775 = vmatpush.bf16.msrb.mxu2 %v1085_v3 }
 0x15a   :  { %v328_v14 = vmax.f32 %v325_v11, 0.0  ;;  %v535_v23 = vunpack.c.l.b16 %v529_v18 }
 0x15b   :  { %v495_v15 = vmax.f32 %v491_v12, 0.0 }
 0x15c   :  { %v330_v16 = vadd.f32 %v328_v14, %v246_v55 }
 0x15d   :  { %v497_v17 = vmul.f32 %v495_v15, %v495_v15  ;;  %776 = vmatpush.bf16.msrb.mxu2 %v1084_v4 }
 0x15e   :  { %v528_v19 = vmax.f32 %v330_v16, 0.0 }
 0x15f   :  { %499 = vadd.xlane.f32.xlu0 %v497_v17 }
 0x160   :  { %v492_v20 = vpop.f32.mrf.mxu3  ;;  %v530_v21 = vpack.c.bf16 %v528_v19, %v528_v19  ;;  %v721_v19 = vperm.slane %v1441_v44, 5 }
 0x161   :  { %v493_v22 = vadd.f32 %v492_v20, %v432_v7  ;;  %777 = vmatpush.bf16.msrb.mxu2 %v1083_v5 }
 0x162   :  { %v536_v24 = vunpack.c.l.b16 %v530_v21 }
 0x163   :  { %v496_v25 = vmax.f32 %v493_v22, 0.0 }
 0x164   :  { %v537_v27 = vpack.c.b16 %v536_v24, %v535_v23 }
 0x165   :  { %v498_v26 = vmul.f32 %v496_v25, %v496_v25 }
 0x166   :  { %682 = vmatmul.bf16.vlgmr.msrb.gmra.mxu0 %v537_v27 }
 0x167   :  { %501 = vadd.xlane.f32.xlu0 %v498_v26 }
 0x1d2   :  { %v500_v36 = vpop.xlane.xlu0 %499 }
 0x1d3   :  { %v503_v37 = vmax.f32 %v500_v36, 1e-24 }
 0x1d5   :  { %1109 = vrsqrt.f32 %v503_v37  ;;  %vm511_vm1 = vweird.f32 %v503_v37 }
 0x1da   :  { %v502_v40 = vpop.xlane.xlu0 %501 }
 0x1db   :  { %v1110_v41 = vpop.eup %1109  ;;  %v504_v42 = vmax.f32 %v502_v40, 1e-24 }
 0x1dc   :  { %v506_v43 = vmul.f32 %v1110_v41, %v503_v37  ;;  %vm512_vm0 = vweird.f32 %v1110_v41 }
 0x1dd   :  { %1111 = vrsqrt.f32 %v504_v42  ;;  %vm513_vm2 = vmor %vm511_vm1, %vm512_vm0  ;;  %vm521_vm4 = vweird.f32 %v504_v42 }
 0x1de   :  { %v507_v46 = vmul.f32 %v1110_v41, %v506_v43 }
 0x1e0   :  { %v508_v47 = vmul.f32 0.5, %v507_v46 }
 0x1e2   :  { %v509_v49 = vsub.f32 1.5, %v508_v47 }
 0x1e3   :  { %v1112_v50 = vpop.eup %1111  ;;  %v683_v6 = vpop.f32.mrf.mxu0 }
 0x1e4   :  { %v510_v51 = vmul.f32 %v1110_v41, %v509_v49  ;;  %v516_v52 = vmul.f32 %v1112_v50, %v504_v42  ;;  %vm522_vm3 = vweird.f32 %v1112_v50  ;;  %v684_v10 = vadd.f32 %v683_v6, %v577_v8 }
 0x1e5   :  { %vm523_vm5 = vmor %vm521_vm4, %vm522_vm3 }
 0x1e6   :  { %v517_v53 = vmul.f32 %v1112_v50, %v516_v52  ;;  %v514_v55 = vsel %vm513_vm2, %v1110_v41, %v510_v51 }
 0x1e7   :  { %v525_v57 = vmul.f32 %v514_v55, %v495_v15 }
 0x1e8   :  { %v518_v54 = vmul.f32 0.5, %v517_v53 }
 0x1e9   :  { %v531_v61 = vpack.c.bf16 %v525_v57, %v525_v57 }
 0x1ea   :  { %v519_v56 = vsub.f32 1.5, %v518_v54 }
 0x1eb   :  { %v541_v63 = vunpack.c.l.b16 %v531_v61  ;;  %v685_v9 = vpop.f32.mrf.mxu0 }
 0x1ec   :  { %v520_v58 = vmul.f32 %v1112_v50, %v519_v56  ;;  %v686_v11 = vadd.f32 %v685_v9, %v577_v8 }
 0x1ee   :  { %v524_v59 = vsel %vm523_vm5, %v1112_v50, %v520_v58 }
 0x1ef   :  { %v526_v60 = vmul.f32 %v524_v59, %v496_v25 }
 0x1f1   :  { %v532_v62 = vpack.c.bf16 %v526_v60, %v526_v60 }
 0x1f3   :  { %v542_v0 = vunpack.c.l.b16 %v532_v62 }
 0x1f5   :  { %v543_v1 = vpack.c.b16 %v542_v0, %v541_v63 }
 0x1f7   :  { %696 = vmatmul.bf16.vlgmr.msrb.gmra.mxu1 %v543_v1 }
 0x274   :  { %v697_v7 = vpop.f32.mrf.mxu1 }
 0x275   :  { %v698_v12 = vadd.f32 %v697_v7, %v684_v10 }
 0x277   :  { %v702_v15 = vmax.f32 %v698_v12, 0.0 }
 0x27c   :  { %v699_v13 = vpop.f32.mrf.mxu1 }
 0x27d   :  { %v700_v14 = vadd.f32 %v699_v13, %v686_v11 }
 0x27f   :  { %v703_v16 = vmax.f32 %v700_v14, 0.0 }
 0x281   :  { %v704_v17 = vpack.c.bf16 %v703_v16, %v702_v15 }
 0x283   :  { %778 = vmatmul.bf16.vlgmr.msrb.gmra.mxu2 %v704_v17 }
 0x306   :  { %v779_v18 = vpop.f32.mrf.mxu2 }
 0x307   :  { %v780_v21 = vadd.f32 %v779_v18, %v721_v19 }
 0x30e   :  { %v781_v20 = vpop.f32.mrf.mxu2 }
 0x30f   :  { %v782_v22 = vadd.f32 %v781_v20, %v721_v19 }
 0x311   :  { %v1094_v23 = vpack.c.bf16 %v782_v22, %v780_v21 }
 0x313   :  { %1095 = vst [vmem:[#allocation16] sm:$0xff] %v1094_v23  }
 0x314   :  { %800 = dma.vmem_to_hbm [thread:$0]  %s793_s20, 128, %s795_s23, [#allocation4], %s1342_s13, %s1342_s13, %s1343_s14  }
 0x315   :  { %1339 = dma.done.wait [#allocation4], 128  }
 0x316   :  { %1340 = vsyncadd [#allocation4], 4294967168 }
 0x317   :  { %805 = vsyncpa [#allocation3], 1 }
 0x318   :  { %806 = vsyncpa [#allocation6], 1 }
 0x319   :  { %807 = vsyncpa [#allocation9], 1 }
 0x31a   :  { %808 = vsyncpa [#allocation12], 1 }
 0x31b   :  { %809 = vsyncpa [#allocation15], 1 }
 0x31c   :  { %810 = vsyncpa [#allocation4], 1 }

</bundles_post_ra>
